<compile_context>
chip_gen: v7x
topology: tpu7x:2x2x1
jax: 0.10.0
libtpu: 0.0.40
codegen_flags: <defaults>
</compile_context>

<pallas_src>
import functools
import math

import jax
import jax.numpy as jnp
from jax.experimental import pallas as pl
from jax.experimental.pallas import tpu as pltpu


def _arcface_kernel(cos_ref, lbl_ref, out_ref, *, s: float,
                    cos_m: float, sin_m: float):
    # cos_ref: (TM, TC) tile of cosines (native dtype)
    # lbl_ref: (TM, 1)  tile of int32 labels (-1 => no margin for this row)
    j = pl.program_id(1)                                   # class-chunk index
    x = cos_ref[...].astype(jnp.float32)                   # (TM, TC) f32 in VMEM
    lbl = lbl_ref[...]                                     # (TM, 1) int32

    tm, tc = x.shape
    # Global column id of each lane within this class chunk.
    col = jax.lax.broadcasted_iota(jnp.int32, (tm, tc), 1) + j * tc
    hit = jnp.logical_and(col == lbl, lbl != -1)           # (TM, TC) bool

    # cos(theta + m) via the angle-addition identity; sin(theta) >= 0 because
    # theta = acos(x) lies in [0, pi].
    sin_t = jnp.sqrt(jnp.clip(1.0 - x * x, 0.0, 1.0))
    with_margin = x * jnp.float32(cos_m) - sin_t * jnp.float32(sin_m)

    out = jnp.where(hit, with_margin, x) * jnp.float32(s)
    out_ref[...] = out.astype(out_ref.dtype)


def _pick_tile(extent: int, target: int, align: int) -> int:
    """Largest legal tile <= target (the full extent is always legal)."""
    if extent <= target:
        return int(extent)
    return int(max((target // align) * align, align))


def arcface_forward(cosine: jax.Array, label: jax.Array,
                    s: float = 64.0, m: float = 0.5,
                    tile_rows: int = 256, tile_cols: int = 2048) -> jax.Array:
    """ArcFace margin forward.

    cosine: [N, C] float32 or bfloat16 logits (cosine similarities)
    label:  [N] int class ids; -1 means "no margin for this row"
    Returns [N, C] in cosine.dtype.
    """
    n, c = cosine.shape
    tm = _pick_tile(n, tile_rows, 8)        # rows: multiple of 8 or full extent
    tc = _pick_tile(c, tile_cols, 128)      # cols: multiple of 128 or full extent

    label2d = label.astype(jnp.int32).reshape(n, 1)
    out_dtype = cosine.dtype

    kernel = functools.partial(
        _arcface_kernel, s=float(s),
        cos_m=math.cos(float(m)), sin_m=math.sin(float(m)))

    # Double-buffered in/out tiles + slack; stay well under v7x's 64 MiB VMEM.
    elem = jnp.dtype(cosine.dtype).itemsize + jnp.dtype(out_dtype).itemsize
    tile_bytes = tm * tc * elem
    vmem_bytes = int(min(max(4 * tile_bytes + (2 << 20), 16 << 20), 56 << 20))

    return pl.pallas_call(
        kernel,
        out_shape=jax.ShapeDtypeStruct((n, c), out_dtype),
        grid_spec=pltpu.PrefetchScalarGridSpec(
            num_scalar_prefetch=0,
            grid=(pl.cdiv(n, tm), pl.cdiv(c, tc)),
            in_specs=[
                pl.BlockSpec((tm, tc), lambda i, j: (i, j)),
                pl.BlockSpec((tm, 1), lambda i, j: (i, 0)),
            ],
            out_specs=pl.BlockSpec((tm, tc), lambda i, j: (i, j)),
        ),
        compiler_params=pltpu.CompilerParams(
            dimension_semantics=("parallel", "parallel"),
            vmem_limit_bytes=vmem_bytes),
    )(cosine, label2d)


def _reference(cosine, label, s=64.0, m=0.5):
    # Pure-JAX reference mirroring the PyTorch in-place ops.
    theta = jnp.arccos(jnp.clip(cosine.astype(jnp.float32), -1.0, 1.0))
    col = jnp.arange(cosine.shape[1])[None, :]
    hit = (col == label[:, None]) & (label[:, None] != -1)
    theta = theta + jnp.where(hit, m, 0.0)
    return jnp.cos(theta) * s


if __name__ == "__main__":
    key = jax.random.PRNGKey(0)
    k1, k2 = jax.random.split(key)

    # Small shapes; tiles chosen so the 2x2 grid (rows x class-chunks) path runs.
    N, C = 32, 512
    cosine = jax.random.uniform(k1, (N, C), jnp.float32,
                                minval=-0.99, maxval=0.99)
    label = jax.random.randint(k2, (N,), 0, C, dtype=jnp.int32)
    # Mark some rows as "ignored" (label == -1), like the torch index filter.
    label = label.at[1].set(-1).at[7].set(-1).at[20].set(-1)

    out = arcface_forward(cosine, label, s=64.0, m=0.5,
                          tile_rows=16, tile_cols=256)
    out = jax.block_until_ready(out)

    ref = _reference(cosine, label, s=64.0, m=0.5)
    assert out.shape == (N, C) and out.dtype == jnp.float32
    assert jnp.allclose(out, ref, atol=2e-3, rtol=2e-3), "mismatch vs reference"

    print("KERNEL_OK")
</pallas_src>

<mosaic_0001>
module attributes {stable_mosaic.version = 11 : i64} {
  func.func @_arcface_kernel(%arg0: i32, %arg1: i32, %arg2: memref<16x256xf32, #tpu.memory_space<vmem>>, %arg3: memref<16x1xi32, #tpu.memory_space<vmem>>, %arg4: memref<16x256xf32, #tpu.memory_space<vmem>>) attributes {dimension_semantics = [#tpu.dimension_semantics<parallel>, #tpu.dimension_semantics<parallel>], iteration_bounds = array<i64: 2, 2>, scalar_prefetch = 0 : i64, scratch_operands = 0 : i64, tpu.core_type = #tpu.core_type<tc>, window_params = [{transform_indices = @transform_0, window_bounds = array<i64: 16, 256>}, {transform_indices = @transform_1, window_bounds = array<i64: 16, 1>}, {transform_indices = @transform_2, window_bounds = array<i64: 16, 256>}]} {
    %c0 = arith.constant 0 : index
    %c0_0 = arith.constant 0 : index
    %0 = vector.load %arg2[%c0, %c0_0] : memref<16x256xf32, #tpu.memory_space<vmem>>, vector<16x256xf32>
    %c0_1 = arith.constant 0 : index
    %c0_2 = arith.constant 0 : index
    %1 = vector.load %arg3[%c0_1, %c0_2] : memref<16x1xi32, #tpu.memory_space<vmem>>, vector<16x1xi32>
    %2 = tpu.iota {dimensions = array<i32: 1>} : vector<16x256xi32>
    %c256_i32 = arith.constant 256 : i32
    %3 = arith.muli %arg1, %c256_i32 : i32
    %4 = vector.broadcast %3 : i32 to vector<16x256xi32>
    %5 = arith.addi %2, %4 : vector<16x256xi32>
    %6 = vector.broadcast %1 : vector<16x1xi32> to vector<16x256xi32>
    %7 = arith.cmpi eq, %5, %6 : vector<16x256xi32>
    %c-1_i32 = arith.constant -1 : i32
    %8 = vector.broadcast %c-1_i32 : i32 to vector<16x1xi32>
    %9 = arith.cmpi ne, %1, %8 : vector<16x1xi32>
    %10 = vector.broadcast %9 : vector<16x1xi1> to vector<16x256xi1>
    %11 = arith.andi %7, %10 : vector<16x256xi1>
    %12 = arith.mulf %0, %0 : vector<16x256xf32>
    %cst = arith.constant 1.000000e+00 : f32
    %13 = vector.broadcast %cst : f32 to vector<16x256xf32>
    %14 = arith.subf %13, %12 : vector<16x256xf32>
    %cst_3 = arith.constant 0.000000e+00 : f32
    %cst_4 = arith.constant 1.000000e+00 : f32
    %15 = vector.broadcast %cst_3 : f32 to vector<16x256xf32>
    %16 = arith.maximumf %15, %14 : vector<16x256xf32>
    %17 = vector.broadcast %cst_4 : f32 to vector<16x256xf32>
    %18 = arith.minimumf %17, %16 : vector<16x256xf32>
    %19 = math.sqrt %18 : vector<16x256xf32>
    %cst_5 = arith.constant 0.87758255 : f32
    %20 = vector.broadcast %cst_5 : f32 to vector<16x256xf32>
    %21 = arith.mulf %0, %20 : vector<16x256xf32>
    %cst_6 = arith.constant 0.47942555 : f32
    %22 = vector.broadcast %cst_6 : f32 to vector<16x256xf32>
    %23 = arith.mulf %19, %22 : vector<16x256xf32>
    %24 = arith.subf %21, %23 : vector<16x256xf32>
    %25 = arith.select %11, %24, %0 : vector<16x256xi1>, vector<16x256xf32>
    %cst_7 = arith.constant 6.400000e+01 : f32
    %26 = vector.broadcast %cst_7 : f32 to vector<16x256xf32>
    %27 = arith.mulf %25, %26 : vector<16x256xf32>
    %c0_8 = arith.constant 0 : index
    %c0_9 = arith.constant 0 : index
    %28 = vector.load %arg4[%c0_8, %c0_9] : memref<16x256xf32, #tpu.memory_space<vmem>>, vector<16x256xf32>
    tpu.vector_store %arg4[%c0_8, %c0_9], %27 {strides = array<i32>} : memref<16x256xf32, #tpu.memory_space<vmem>>, vector<16x256xf32>,
    return
  }
  func.func @transform_0(%arg0: i32, %arg1: i32) -> (i32, i32) {
    %c0_i32 = arith.constant 0 : i32
    return %arg0, %arg1 : i32, i32
  }
  func.func @transform_1(%arg0: i32, %arg1: i32) -> (i32, i32) {
    %c0_i32 = arith.constant 0 : i32
    %c0_i32_0 = arith.constant 0 : i32
    return %arg0, %c0_i32 : i32, i32
  }
  func.func @transform_2(%arg0: i32, %arg1: i32) -> (i32, i32) {
    %c0_i32 = arith.constant 0 : i32
    return %arg0, %arg1 : i32, i32
  }
}

</mosaic_0001>

<bundles_post_ra>
// kernel: tpu_custom_call.1
= control target key start
LH: loop header
LB: loop body
LE: loop exit
PB: predicated region body
PF: predicated region fallthrough
CT: control target
= control target key end

     0   :  { %7 = vsyncpa [#allocation3], 0  ;;  %s936_s0 = inlined_call_operand.hbm [shape: f32[32,512], index: 0, kind: input, shape index: {}]   ;;  %s937_s1 = inlined_call_operand.vmem [shape: s32[32,1], index: 1, kind: input, shape index: {}]   ;;  %s938_s2 = inlined_call_operand.hbm [shape: f32[32,512], index: 2, kind: output, shape index: {}]  }
   0x1   :  { %9 = vsyncpa [#allocation3 + $0x1], 0 }
   0x2   :  { %10 = vsyncpa [#allocation4], 0 }
   0x3   :  { %12 = vsyncpa [#allocation4 + $0x1], 0  ;;  %s706_s9 = smov 0   ;;  %s708_s10 = smov 0  }
   0x4   :  { %s710_s11 = smov 0   ;;  %s712_s12 = smov 0  }
   0x5   :  { %s714_s13 = smov 0   ;;  %s716_s14 = smov 0  }
   0x6   :  { %s718_s15 = smov 0   ;;  %s720_s16 = smov 0  }
   0x7 LB: > { %s433_s17 = sadd.s32 4294967295, %s680_s16   ;;  %s434_s18 = sadd.s32 4294967294, %s680_s16   ;;  %s680_s16 = sphi %s720_s16, %s18_s16   ;;  %s676_s15 = sphi %s718_s15, %s954_s15   ;;  %s672_s14 = sphi %s716_s14, %s953_s14   ;;  %s668_s13 = sphi %s714_s13, %s952_s13   ;;  %s664_s12 = sphi %s712_s12, %s951_s12   ;;  %s660_s11 = sphi %s710_s11, %s950_s11   ;;  %s656_s10 = sphi %s708_s10, %s949_s10   ;;  %s652_s9 = sphi %s706_s9, %s948_s9  }
   0x8   : > { %s27_s19 = sadd.s32 1, %s672_s14  ;;  %s30_s20 = sadd.s32 1, %s676_s15 }
   0x9   : > { %p28_p0 = scmp.ge.s32.totalorder %s27_s19, 2  ;;  %s39_s21 = sadd.s32 1, %s660_s11 }
   0xa   : > { %p46_p1 = scmp.ne.s32.totalorder %s660_s11, %s656_s10  ;;  %p47_p2 = scmp.eq.s32.totalorder %s680_s16, 0 }
   0xb   : > { %s956_s19 = smov (%p28_p0, %s27_s19), 0  ;;  %s958_s20 = smov (!%p28_p0, %s30_s20), %s676_s15 }
   0xc   : > { %s35_s22 = ssub.s32 %s672_s14, %s956_s19  ;;  %p759_p3 = por %p47_p2, %p46_p1 }
   0xd   : > { %p32_p4 = scmp.ge.s32.totalorder %s958_s20, 2  ;;  %p52_p5 = scmp.ne.s32.totalorder %s656_s10, %s652_s9 }
   0xe   : > { %p53_p6 = scmp.eq.s32.totalorder %s433_s17, 0  ;;  %p104_p7 = scmp.eq.s32.totalorder %s433_s17, 3 }
   0xf   : > { %s960_s20 = smov (%p32_p4, %s958_s20), 0  ;;  %p110_p10 = scmp.eq.s32.totalorder %s434_s18, 3 }
  0x10   : > { %p767_p8 = por %p53_p6, %p52_p5  ;;  %p771_p9 = por %p104_p7, %p46_p1 }
  0x11   : > { %s34_s26 = ssub.s32 %s676_s15, %s960_s20  ;;  %p777_p12 = por %p110_p10, %p52_p5 }
  0x12   : > { %s942_s25 = scalar_select %p771_p9, 1, 0 }
  0x13   : > { %s36_s27 = sor.u32 %s35_s22, %s34_s26  ;;  %p469_p13 = scmp.lt.s32.totalorder %s680_s16, 4 }
  0x14   : > { %p37_p11 = scmp.eq.s32.totalorder %s36_s27, 0  ;;  %s130_s29 = sand.u32 1, %s660_s11  }
  0x15   : > { %s943_s28 = scalar_select %p777_p12, 1, 0 }
  0x16   : > { %s784_s30 = scalar_select %p37_p11, %s660_s11, %s39_s21  }
  0x17   : > { %s437_s3 = sshll.u32 %s130_s29, 5  ;;  %s439_s4 = sshll.u32 %s672_s14, 1 }
  0x18   : > { %s455_s5 = sshll.u32 %s676_s15, 3  ;;  %s134_s6 = scalar_lea.vmem [#allocation2], %s437_s3 }
  0x19   : > { %s144_s7 = sshll.u32 %s134_s6, 4  ;;  %s141_s8 = sadd.s32 %s455_s5, %s439_s4  ;;  %s788_s7 = int_to_ptr.vmem [resolvable:$true] %s144_s7 }
  0x1a   : > { %s441_s17 = sshll.u32 %s141_s8, 7  ;;  %p792_p0 = pnand %p469_p13, %p759_p3 }
  0x1b   : > { %s799_s21 = scalar_lea.hbm %s936_s0, %s441_s17  ;;  %s802_s27 = scalar_lea.sflag [#allocation3], %s130_s29 }
  0x1c   : > { %s552_s3 = scalar_lea.hbm %s799_s21, 512  ;;  %p554_p3 = pneg %p792_p0 }
  0x1d   : > { %p553_p2 = scmp.ne.s32.totalorder %s799_s21, %s552_s3  ;;  %s557_s5 = scalar_lea.hbm %s936_s0, 2048 }
  0x1e   : > { %p558_p6 = scmp.lt.u32.totalorder %s799_s21, %s936_s0  ;;  %p559_p7 = scmp.lt.u32.totalorder %s557_s5, %s552_s3 }
  0x1f   : > { %p555_p4 = pnand %p554_p3, %p553_p2  ;;  %p561_p11 = scmp.lt.u32.totalorder %s552_s3, %s799_s21 }
  0x20   : > { %p560_p10 = por %p559_p7, %p558_p6 }
  0x21   : > { %p556_p5 = pneg %p555_p4 }
  0x22   : > { %p562_p13 = por %p561_p11, %p560_p10 }
  0x24   : > { %p563_p1 = pnand %p562_p13, %p556_p5 }
  0x26   : > { %566 = shalt.err (!%p563_p1)
}
  0x27   : > { %s567_s29 = scalar_lea.vmem %s788_s7, 512  ;;  %s682_s17 = smov [#allocation2]  }
  0x28   : > { %p568_p2 = scmp.ne.s32.totalorder %s788_s7, %s567_s29  ;;  %s572_s22 = sshll.u32 %s682_s17, 4  ;;  %s573_s22 = int_to_ptr.vmem [resolvable:$false] %s572_s22 }
  0x29   : > { %s574_s26 = scalar_lea.vmem %s573_s22, 1024  ;;  %p575_p9 = scmp.lt.s32.totalorder %s788_s7, %s573_s22 }
  0x2a   : > { %p570_p4 = pnand %p568_p2, %p554_p3  ;;  %p576_p6 = scmp.lt.s32.totalorder %s574_s26, %s567_s29 }
  0x2c   : > { %p571_p12 = pneg %p570_p4  ;;  %p577_p7 = por %p576_p6, %p575_p9 }
  0x2e   : > { %p578_p10 = pnand %p577_p7, %p571_p12 }
  0x30   : > { %581 = shalt.err (!%p578_p10)
}
  0x31   : > { %s683_s3 = smov 512   ;;  %s684_s23 = smov 256  }
  0x32   : > { %s685_s4 = smov 16   ;;  %p161_p1 = scmp.lt.s32.totalorder %s680_s16, 5 }
  0x33   : > { %464 = dma.hbm_to_vmem [thread:$0]  (!%p792_p0), %s799_s21, 512, %s788_s7, %s802_s27, %s683_s3, %s684_s23, %s685_s4  }
  0x34   : > { %p945_p3 = scmp.ge.s32.totalorder %s680_s16, 1 }
  0x36   : > { %p162_p5 = pnand %p945_p3, %p161_p1 }
  0x37   : > { %s834_s5 = sand.u32 (!%p162_p5), 1, %s656_s10  }
  0x38   : > { %165 = sbr.rel (%p162_p5) target bundleno = 227 (0xe3), region = 28  ;;  %s443_s6 = sshll.u32 (!%p162_p5), %s834_s5, 5 }
  0x39   : > { %s168_s8 = scalar_lea.sflag (!%p162_p5), [#allocation3], %s834_s5  ;;  %s171_s29 = scalar_lea.vmem (!%p162_p5), [#allocation2], %s443_s6 }
  0x3f   : > { %643 = dma.done.wait (%p767_p8), %s168_s8, 512  }
  0x40   : > { %645 = vsyncadd (%p767_p8), %s168_s8, 4294966784  ;;  %s445_s7 = sshll.u32 %s668_s13, 1  ;;  %v686_v0 = vmov 0   ;;  %v848_v5 = vld [vmem:[%s171_s29] sm:$0xff]  ;;  %v850_v6 = vld [vmem:[%s171_s29 + $0x8] sm:$0xff]  ;;  %v213_v27 = vlaneseq  ;;  %s447_s24 = sshll.u32 %s664_s12, 8 }
  0x41   : > { %542 = vset.pattern.permute.xlu0 %v686_v0  ;;  %p200_p9 = scmp.lt.s32.totalorder %s445_s7, 3  ;;  %543 = vset.pattern.permute.xlu1 %v686_v0  ;;  %v246_v7 = vmul.f32 %v848_v5, %v848_v5  ;;  %v247_v8 = vmul.f32 %v850_v6, %v850_v6  ;;  %v856_v9 = vld [vmem:[%s171_s29 + $0x10] sm:$0xff]  ;;  %v858_v10 = vld [vmem:[%s171_s29 + $0x18] sm:$0xff]  ;;  %v217_v40 = vstv %s447_s24  ;;  %v290_v48 = vmul.f32 0.87758255, %v848_v5  ;;  %s450_s22 = sshll.u32 %s664_s12, 1 }
  0x42   : > { %v248_v12 = vmul.f32 %v856_v9, %v856_v9  ;;  %v249_v14 = vmul.f32 %v858_v10, %v858_v10  ;;  %v214_v32 = vand.u32 127, %v213_v27  ;;  %v291_v51 = vmul.f32 0.87758255, %v850_v6  ;;  %s456_s26 = sshll.u32 %s668_s13, 3  ;;  %s196_s23 = scalar_lea.vmem [#allocation5], %s443_s6 }
  0x43   : > { %s962_s7 = smov (!%p200_p9, %s445_s7), 3  ;;  %v250_v11 = vsub.f32 1.0, %v246_v7  ;;  %v251_v13 = vsub.f32 1.0, %v247_v8  ;;  %v292_v57 = vmul.f32 0.87758255, %v856_v9  ;;  %s328_s3 = sadd.s32 %s456_s26, %s450_s22 }
  0x44   : > { %s446_s18 = sshll.u32 %s962_s7, 3  ;;  %v252_v16 = vsub.f32 1.0, %v248_v12  ;;  %v253_v18 = vsub.f32 1.0, %v249_v14  ;;  %v215_v39 = vadd.s32 128, %v214_v32  ;;  %v218_v47 = vadd.s32 %v217_v40, %v214_v32  ;;  %s331_s4 = sshll.u32 %s196_s23, 4  ;;  %s875_s4 = int_to_ptr.vmem [resolvable:$true] %s331_s4 }
  0x45   : > { %s203_s17 = scalar_lea.vmem %s937_s1, %s446_s18  ;;  %v254_v15 = vmax.f32 %v250_v11, 0.0  ;;  %v255_v17 = vmax.f32 %v251_v13, 0.0  ;;  %v293_v61 = vmul.f32 0.87758255, %v858_v10  ;;  %s452_s12 = sshll.u32 %s328_s3, 7 }
  0x46   : > { %v211_v1 = vld [vmem:[%s203_s17] sm:$0xff]  ;;  %v212_v2 = vld [vmem:[%s203_s17 + $0x8] sm:$0xff]  ;;  %v256_v20 = vmax.f32 %v252_v16, 0.0  ;;  %v257_v22 = vmax.f32 %v253_v18, 0.0  ;;  %v219_v50 = vadd.s32 %v217_v40, %v215_v39  ;;  %s882_s8 = scalar_lea.hbm %s938_s2, %s452_s12  ;;  %s315_s29 = scalar_lea.sflag [#allocation4], %s834_s5 }
  0x47   : > { %221 = vperm.xlu0 %542, %v211_v1   ;;  %vm230_vm0 = vcmp.ne.s32.totalorder %v211_v1, 4294967295  ;;  %vm231_vm1 = vcmp.ne.s32.totalorder %v212_v2, 4294967295  ;;  %v258_v19 = vmin.f32 %v254_v15, 1.0  ;;  %v259_v21 = vmin.f32 %v255_v17, 1.0  ;;  %s582_s7 = scalar_lea.vmem %s875_s4, 512  ;;  %p946_p12 = scmp.ne.s32.totalorder %s942_s25, 0 }
  0x48   : > { %v232_v3 = vsel %vm230_vm0, 1, %v686_v0  ;;  %v233_v4 = vsel %vm231_vm1, 1, %v686_v0  ;;  %v260_v23 = vmin.f32 %v256_v20, 1.0  ;;  %v261_v24 = vmin.f32 %v257_v22, 1.0  ;;  %p583_p8 = scmp.ne.s32.totalorder %s875_s4, %s582_s7  ;;  %s687_s18 = smov [#allocation5]  }
  0x49   : > { %235 = vperm.xlu1 %543, %v232_v3   ;;  %544 = vrsqrt.f32 %v258_v19  ;;  %vm264_vm2 = vcmp.eq.f32.partialorder %v258_v19, inf  ;;  %vm271_vm3 = vcmp.eq.f32.partialorder %v259_v21, inf  ;;  %v267_v33 = vand.u32 2147483648, %v258_v19  ;;  %s586_s21 = sshll.u32 %s687_s18, 4  ;;  %s587_s21 = int_to_ptr.vmem [resolvable:$false] %s586_s21 }
  0x4a   : > { %546 = vrsqrt.f32 %v259_v21  ;;  %vm266_vm4 = vcmp.eq.f32.partialorder %v258_v19, 0.0  ;;  %v274_v35 = vand.u32 2147483648, %v259_v21  ;;  %vm273_vm5 = vcmp.eq.f32.partialorder %v259_v21, 0.0  ;;  %p584_p0 = pnand %p583_p8, %p946_p12  ;;  %s588_s27 = scalar_lea.vmem %s587_s21, 1024 }
  0x4b   : > { %224 = vperm.xlu0 %542, %v212_v2   ;;  %548 = vrsqrt.f32 %v260_v23  ;;  %vm278_vm6 = vcmp.eq.f32.partialorder %v260_v23, inf  ;;  %vm285_vm7 = vcmp.eq.f32.partialorder %v261_v24, inf  ;;  %v281_v42 = vand.u32 2147483648, %v260_v23  ;;  %p589_p13 = scmp.lt.s32.totalorder %s875_s4, %s587_s21  ;;  %p590_p2 = scmp.lt.s32.totalorder %s588_s27, %s582_s7 }
  0x4c   : > { %550 = vrsqrt.f32 %v261_v24  ;;  %vm280_vm8 = vcmp.eq.f32.partialorder %v260_v23, 0.0  ;;  %v288_v45 = vand.u32 2147483648, %v261_v24  ;;  %vm287_vm9 = vcmp.eq.f32.partialorder %v261_v24, 0.0  ;;  %p585_p11 = pneg %p584_p0 }
  0x4d   : > { %238 = vperm.xlu1 %543, %v233_v4   ;;  %p591_p4 = por %p590_p2, %p589_p13 }
  0x4f   : > { %p592_p6 = pnand %p591_p4, %p585_p11 }
  0x53   : > { %v545_v25 = vpop.eup %544 }
  0x54   : > { %v547_v26 = vpop.eup %546  ;;  %v263_v28 = vmul.f32 %v545_v25, %v258_v19 }
  0x55   : > { %v549_v29 = vpop.eup %548  ;;  %v270_v30 = vmul.f32 %v547_v26, %v259_v21 }
  0x56   : > { %v551_v31 = vpop.eup %550  ;;  %v265_v34 = vsel %vm264_vm2, %v258_v19, %v263_v28  ;;  %v277_v36 = vmul.f32 %v549_v29, %v260_v23 }
  0x57   : > { %v272_v37 = vsel %vm271_vm3, %v259_v21, %v270_v30  ;;  %v284_v38 = vmul.f32 %v551_v31, %v261_v24  ;;  %v268_v41 = vsel %vm266_vm4, %v267_v33, %v265_v34 }
  0x58   : > { %v275_v43 = vsel %vm273_vm5, %v274_v35, %v272_v37  ;;  %v279_v44 = vsel %vm278_vm6, %v260_v23, %v277_v36  ;;  %v294_v49 = vmul.f32 0.47942555, %v268_v41 }
  0x59   : > { %v286_v46 = vsel %vm285_vm7, %v261_v24, %v284_v38  ;;  %v295_v52 = vmul.f32 0.47942555, %v275_v43  ;;  %v282_v53 = vsel %vm280_vm8, %v281_v42, %v279_v44 }
  0x5a   : > { %v289_v54 = vsel %vm287_vm9, %v288_v45, %v286_v46  ;;  %v298_v56 = vsub.f32 %v290_v48, %v294_v49  ;;  %v296_v58 = vmul.f32 0.47942555, %v282_v53 }
  0x5b   : > { %v299_v60 = vsub.f32 %v291_v51, %v295_v52  ;;  %v297_v62 = vmul.f32 0.47942555, %v289_v54 }
  0x5c   : > { %v300_v1 = vsub.f32 %v292_v57, %v296_v58 }
  0x5d   : > { %v301_v7 = vsub.f32 %v293_v61, %v297_v62 }
  0xc6   : > { %v222_v55 = vpop.permute.xlu0 %221 }
  0xc7   : > { %vm226_vm10 = vcmp.eq.s32.totalorder %v218_v47, %v222_v55  ;;  %vm227_vm11 = vcmp.eq.s32.totalorder %v219_v50, %v222_v55 }
  0xc8   : > { %v236_v59 = vpop.permute.xlu1 %235 }
  0xc9   : > { %vm240_vm12 = vcmp.eq.s32.totalorder %v236_v59, 1 }
  0xca   : > { %vm242_vm13 = vmand %vm226_vm10, %vm240_vm12  ;;  %v225_v63 = vpop.permute.xlu0 %224 }
  0xcb   : > { %vm243_vm14 = vmand %vm227_vm11, %vm240_vm12  ;;  %v302_v0 = vsel %vm242_vm13, %v298_v56, %v848_v5  ;;  %vm228_vm15 = vcmp.eq.s32.totalorder %v218_v47, %v225_v63  ;;  %vm229_vm1 = vcmp.eq.s32.totalorder %v219_v50, %v225_v63 }
  0xcc   : > { %v303_v2 = vsel %vm243_vm14, %v299_v60, %v850_v6  ;;  %v306_v3 = vmul.f32 64.0, %v302_v0  ;;  %v239_v4 = vpop.permute.xlu1 %238 }
  0xcd   : > { %v307_v8 = vmul.f32 64.0, %v303_v2  ;;  %vm241_vm0 = vcmp.eq.s32.totalorder %v239_v4, 1 }
  0xce   : > { %310 = vst [vmem:[%s196_s23] sm:$0xff] %v306_v3  ;;  %vm244_vm2 = vmand %vm228_vm15, %vm241_vm0 }
  0xcf   : > { %311 = vst [vmem:[%s196_s23 + $0x8] sm:$0xff] %v307_v8  ;;  %vm245_vm3 = vmand %vm229_vm1, %vm241_vm0  ;;  %v304_v5 = vsel %vm244_vm2, %v300_v1, %v856_v9 }
  0xd0   : > { %v305_v6 = vsel %vm245_vm3, %v301_v7, %v858_v10  ;;  %v308_v11 = vmul.f32 64.0, %v304_v5 }
  0xd1   : > { %v309_v12 = vmul.f32 64.0, %v305_v6 }
  0xd2   : > { %312 = vst [vmem:[%s196_s23 + $0x10] sm:$0xff] %v308_v11 }
  0xd3   : > { %313 = vst [vmem:[%s196_s23 + $0x18] sm:$0xff] %v309_v12 }
  0xd4   : > { %595 = shalt.err (!%p592_p6)
}
  0xd5   : > { %s596_s17 = scalar_lea.hbm %s882_s8, 512  ;;  %s600_s26 = scalar_lea.hbm %s938_s2, 2048 }
  0xd6   : > { %p597_p7 = scmp.ne.s32.totalorder %s882_s8, %s596_s17  ;;  %p601_p3 = scmp.lt.u32.totalorder %s882_s8, %s938_s2 }
  0xd7   : > { %p602_p5 = scmp.lt.u32.totalorder %s600_s26, %s596_s17  ;;  %p604_p8 = scmp.lt.u32.totalorder %s596_s17, %s882_s8 }
  0xd8   : > { %p598_p10 = pnand %p597_p7, %p946_p12 }
  0xd9   : > { %p603_p9 = por %p602_p5, %p601_p3 }
  0xda   : > { %p599_p1 = pneg %p598_p10 }
  0xdb   : > { %p605_p0 = por %p604_p8, %p603_p9 }
  0xdd   : > { %p606_p11 = pnand %p605_p0, %p599_p1 }
  0xdf   : > { %609 = shalt.err (!%p606_p11)
}
  0xe0   : > { %s688_s12 = smov 256   ;;  %s689_s13 = smov 512  }
  0xe1   : > { %s690_s6 = smov 16  }
  0xe2   : > { %459 = dma.vmem_to_hbm [thread:$0]  (%p946_p12), %s875_s4, 512, %s882_s8, %s315_s29, %s688_s12, %s689_s13, %s690_s6  }
  0xe3 PF: > { %p470_p13 = scmp.ge.s32.totalorder %s680_s16, 2  ;;  %s346_s7 = sand.u32 1, %s652_s9  }
  0xe4   : > { %p947_p2 = scmp.ne.s32.totalorder %s943_s28, 0  ;;  %s347_s18 = scalar_lea.sflag [#allocation4], %s346_s7 }
  0xe6   : > { %p466_p4 = pnand %p470_p13, %p947_p2 }
  0xe8   : > { %647 = dma.done.wait (!%p466_p4), %s347_s18, 512  }
  0xe9   : > { %649 = vsyncadd (!%p466_p4), %s347_s18, 4294966784  ;;  %s18_s16 = sadd.s32 1, %s680_s16   ;;  %s948_s9 = smov %s656_s10 }
  0xea   : > { %p15_p6 = scmp.ge.s32.totalorder %s18_s16, 6   ;;  %s949_s10 = smov %s660_s11 }
  0xeb   : > { %s950_s11 = smov %s784_s30  ;;  %s951_s12 = smov %s672_s14 }
  0xec   : > { %s952_s13 = smov %s676_s15  ;;  %s953_s14 = smov %s956_s19 }
  0xed   : > { %s954_s15 = smov %s960_s20  ;;  %17 = sbr.rel (!%p15_p6) target bundleno = 7 (0x7), region = 76 }
  0xf4   :  { %352 = vsyncpa [#allocation3], 1 }
  0xf5   :  { %354 = vsyncpa [#allocation3 + $0x1], 1 }
  0xf6   :  { %355 = vsyncpa [#allocation4], 1 }
  0xf7   :  { %357 = vsyncpa [#allocation4 + $0x1], 1 }

</bundles_post_ra>
